<compile_context>
chip_gen: v7x
topology: tpu7x:2x2x1
jax: 0.10.0
libtpu: 0.0.40
codegen_flags: <defaults>
</compile_context>

<pallas_src>
import functools

import jax
import jax.numpy as jnp
from jax.experimental import pallas as pl
from jax.experimental.pallas import tpu as pltpu


# ------------------------------ helpers ----------------------------------- #

def _round_up(x, m):
    return (x + m - 1) // m * m


def _pick_tile(dim, align, max_tile):
    """Choose (tile, padded_dim): tile is `align`-aligned and <= max_tile.

    dim <= max_tile  -> one full-extent tile (rounded up to `align`).
    dim  > max_tile  -> split into ceil(dim/max_tile) near-equal tiles, so
                        padding waste is < `align` per block (not a whole tile)
                        and there are >= 2 blocks for megacore sharding.
    """
    if dim <= max_tile:
        t = _round_up(dim, align)
        return t, t
    nblocks = -(-dim // max_tile)
    t = _round_up(-(-dim // nblocks), align)
    return t, t * nblocks


@functools.lru_cache(maxsize=None)
def _vmem_limit_bytes():
    # ~75% of physical VMEM: v5e/v6e 128 MiB -> 96 MiB, v7x 64 MiB -> 48 MiB.
    # Never request all of it (compiler scratch needs headroom).
    try:
        cap = int(pltpu.get_tpu_info().vmem_capacity_bytes)
        return int(min(cap * 3 // 4, 96 << 20))
    except Exception:
        return 48 << 20  # safe on every generation


# ----------------------------- Pallas kernel ------------------------------ #

def _linear_kernel(x_ref, w_ref, b_ref, o_ref, acc_ref):
    k = pl.program_id(2)

    @pl.when(k == 0)
    def _():
        acc_ref[...] = jnp.zeros_like(acc_ref)

    # x arrives f32 (no wrapper pad/cast copy); cast the VMEM tile to bf16 on
    # the VPU. W is stored bf16 -> bf16 x bf16 with f32 accumulation on the MXU.
    acc_ref[...] += jnp.dot(x_ref[...].astype(jnp.bfloat16), w_ref[...],
                            preferred_element_type=jnp.float32)

    @pl.when(k == pl.num_programs(2) - 1)
    def _():
        # f32 epilogue (bias add, once) + single cast at the final store.
        o_ref[...] = (acc_ref[...] + b_ref[...]).astype(o_ref.dtype)


@functools.partial(jax.jit, static_argnames=("tk", "tn", "n_valid", "tm_max"))
def pallas_linear_2d(x2d, wp, bp, *, tk, tn, n_valid, tm_max=512):
    """y[:, :n_valid] = x2d @ wp[:K, :n_valid] + bp[0, :n_valid].

    x2d: [M, K] f32 (unpadded activations),
    wp:  [Kp, Np] bf16 (pre-padded + pre-cast once at init, Kp % tk == 0),
    bp:  [1, Np] f32  (pre-padded, Np % tn == 0).
    Returns [M, n_valid] f32.
    """
    M, K = x2d.shape
    Kp, Np = wp.shape
    assert Kp % tk == 0 and Np % tn == 0 and Kp >= K and Np >= n_valid

    TM, Mp = _pick_tile(M, 16, tm_max)  # 16-row multiple (bf16 sublane safety)

    # Only x may need padding here (M rows to a TM multiple, K cols up to the
    # weight's pre-padded Kp).  Zero K-padding is required for the reduction.
    if Mp > M or Kp > K:
        x2d = jnp.pad(x2d, ((0, Mp - M), (0, Kp - K)))

    grid = (Mp // TM, Np // tn, Kp // tk)

    cost = pl.CostEstimate(
        flops=2 * Mp * Kp * Np,
        transcendentals=0,
        bytes_accessed=(Mp * Kp * 4 * (Np // tn)      # x re-read per N block
                        + Kp * Np * 2 * (Mp // TM)    # W re-read per M block
                        + Np * 4 * (Mp // TM)         # bias
                        + Mp * Np * 4),               # output write
    )

    out = pl.pallas_call(
        _linear_kernel,
        out_shape=jax.ShapeDtypeStruct((Mp, Np), x2d.dtype),
        grid_spec=pltpu.PrefetchScalarGridSpec(
            num_scalar_prefetch=0,
            grid=grid,
            in_specs=[
                pl.BlockSpec((TM, tk), lambda i, j, k: (i, k)),   # x: stream M, K
                pl.BlockSpec((tk, tn), lambda i, j, k: (k, j)),   # W: stream K, N
                pl.BlockSpec((1, tn), lambda i, j, k: (0, j)),    # bias: N only
            ],
            out_specs=pl.BlockSpec((TM, tn), lambda i, j, k: (i, j)),
            scratch_shapes=[pltpu.VMEM((TM, tn), jnp.float32)],
        ),
        compiler_params=pltpu.CompilerParams(
            dimension_semantics=("parallel", "parallel", "arbitrary"),
            vmem_limit_bytes=_vmem_limit_bytes(),
        ),
        cost_estimate=cost,
    )(x2d, wp, bp)

    # Slice only when padding actually happened (otherwise zero-copy return).
    if Mp > M or Np > n_valid:
        out = out[:M, :n_valid]
    return out


# --------------------------- Module equivalents ---------------------------- #

class PallasLinear:
    """Equivalent of the `Linear(in_features, out_features, hparams=...)` used
    by build_residual_projection, applied to axis 2 of [B, T, C]."""

    # Tile ceilings: big enough to hide per-step overhead on every generation,
    # small enough that double-buffered VMEM stays well under v7x's 64 MiB.
    TK_MAX = 2048
    TN_MAX = 512
    TM_MAX = 512

    def __init__(self, in_features, out_features, key, hparams=None):
        self.hparams = hparams
        self.in_features = in_features
        self.out_features = out_features

        kw, kb = jax.random.split(key)
        bound = 1.0 / (in_features ** 0.5)   # torch Linear default init range
        # Stored transposed to [in, out] for the kernel (x @ W layout).
        self.weight = jax.random.uniform(
            kw, (in_features, out_features), jnp.float32, -bound, bound)
        self.bias = jax.random.uniform(
            kb, (out_features,), jnp.float32, -bound, bound)

        # Static params: pad + cast ONCE (not per call).
        tk, kp = _pick_tile(in_features, 128, self.TK_MAX)
        tn, np_ = _pick_tile(out_features, 128, self.TN_MAX)
        self._tk, self._tn = tk, tn
        self._w_padded = jnp.pad(
            self.weight,
            ((0, kp - in_features), (0, np_ - out_features))).astype(jnp.bfloat16)
        self._b_padded = jnp.pad(
            self.bias, (0, np_ - out_features)).astype(jnp.float32).reshape(1, np_)

    def __call__(self, x):
        # x: [B, T, Cin] -> [B, T, Cout].  Flatten to [B*T, Cin] so the M tile
        # is as large as possible.
        B, T, Cin = x.shape
        y2d = pallas_linear_2d(
            x.reshape(B * T, Cin), self._w_padded, self._b_padded,
            tk=self._tk, tn=self._tn, n_valid=self.out_features,
            tm_max=self.TM_MAX)
        return y2d.reshape(B, T, self.out_features)


class ChildLayer:
    def __init__(self, hparams):
        self.hparams = hparams
        self.residual_projection = None
        self.preprocessors = []
        self.postprocessors = []

    def forward(self, *args):
        # TODO(synk): forward() is abstract (raises NotImplementedError) in the
        # reference base class; no forward body is translated.
        raise NotImplementedError

    def build_residual_projection(self, input_shape, output_shape, key):
        self.residual_projection = (
            PallasLinear(input_shape[2], output_shape[2], key,
                         hparams=self.hparams)
            if tuple(input_shape) != tuple(output_shape) else None)

    def preprocess(self, x):
        if self.preprocessors is None:
            return x
        for m in self.preprocessors:
            x = m(x)
        return x

    def postprocess(self, x, input_):
        if self.postprocessors is None:
            return x
        input_ = self.modify_input_before_postprocess(input_)
        for m in self.postprocessors:
            x = m(x, input_)
        return x

    def modify_input_before_postprocess(self, input_):
        if self.residual_projection is not None:
            input_ = self.residual_projection(input_)
        return input_

    def simplify(self):
        self.preprocessors = None
        self.postprocessors = None
        return self


# --------------------------------- main ------------------------------------ #

def _ref_linear_bf16(x2d, w, b):
    # bf16-operand / f32-accumulation reference (matches kernel numerics).
    xb = x2d.astype(jnp.bfloat16).astype(jnp.float32)
    wb = w.astype(jnp.bfloat16).astype(jnp.float32)
    return jnp.dot(xb, wb, precision=jax.lax.Precision.HIGHEST) + b


if __name__ == "__main__":
    key = jax.random.PRNGKey(0)
    k_x, k_lin, k_x2, k_lin2, k_x3, k_w3, k_b3 = jax.random.split(key, 7)

    # ---- small shapes consistent with the module: [batch, seq, hidden] ----
    B, T, C_IN, C_OUT = 2, 8, 32, 48
    x = jax.random.normal(k_x, (B, T, C_IN), jnp.float32)

    layer = ChildLayer(hparams={"hidden_size": C_IN})
    # input_shape != output_shape -> residual projection Linear is built.
    layer.build_residual_projection((B, T, C_IN), (B, T, C_OUT), k_lin)

    x_pre = layer.preprocess(x)                         # identity (empty list)
    proj = layer.modify_input_before_postprocess(x_pre)  # Pallas hot path
    proj = jax.block_until_ready(proj)
    y = jax.block_until_ready(layer.postprocess(x_pre, x_pre))

    ref = _ref_linear_bf16(
        x_pre.reshape(B * T, C_IN),
        layer.residual_projection.weight,
        layer.residual_projection.bias).reshape(B, T, C_OUT)
    assert proj.shape == (B, T, C_OUT)
    assert jnp.allclose(proj, ref, atol=1e-3, rtol=1e-3), \
        float(jnp.max(jnp.abs(proj - ref)))
    assert jnp.array_equal(y, x_pre)

    # ---- a shape that tiles cleanly: zero padding, zero output slice ----
    B2, T2, C_IN2, C_OUT2 = 2, 256, 512, 384
    x2 = jax.random.normal(k_x2, (B2, T2, C_IN2), jnp.float32)
    layer2 = ChildLayer(hparams={"hidden_size": C_IN2})
    layer2.build_residual_projection((B2, T2, C_IN2), (B2, T2, C_OUT2), k_lin2)
    proj2 = jax.block_until_ready(layer2.modify_input_before_postprocess(x2))
    ref2 = _ref_linear_bf16(
        x2.reshape(B2 * T2, C_IN2),
        layer2.residual_projection.weight,
        layer2.residual_projection.bias).reshape(B2, T2, C_OUT2)
    assert proj2.shape == (B2, T2, C_OUT2)
    assert jnp.allclose(proj2, ref2, atol=1e-3, rtol=1e-3), \
        float(jnp.max(jnp.abs(proj2 - ref2)))

    # ---- direct kernel call with small tiles: exercises a full (3,2,2) grid,
    # ---- M padding + output slice, and the k-reduction accumulator path ----
    M3, K3, N3 = 640, 256, 256
    x3 = jax.random.normal(k_x3, (M3, K3), jnp.float32)
    w3 = jax.random.normal(k_w3, (K3, N3), jnp.float32) * 0.05
    b3 = jax.random.normal(k_b3, (N3,), jnp.float32)
    y3 = pallas_linear_2d(
        x3, w3.astype(jnp.bfloat16), b3.reshape(1, N3),
        tk=128, tn=128, n_valid=N3, tm_max=256)
    y3 = jax.block_until_ready(y3)
    ref3 = _ref_linear_bf16(x3, w3, b3)
    assert y3.shape == (M3, N3)
    assert jnp.allclose(y3, ref3, atol=1e-3, rtol=1e-3), \
        float(jnp.max(jnp.abs(y3 - ref3)))

    print("KERNEL_OK")
</pallas_src>

<mosaic_0001>
module attributes {stable_mosaic.version = 11 : i64} {
  func.func @_linear_kernel(%arg0: i32, %arg1: i32, %arg2: i32, %arg3: memref<16x128xf32, #tpu.memory_space<vmem>>, %arg4: memref<128x128xbf16, #tpu.memory_space<vmem>>, %arg5: memref<1x128xf32, #tpu.memory_space<vmem>>, %arg6: memref<16x128xf32, #tpu.memory_space<vmem>>, %arg7: memref<16x128xf32, #tpu.memory_space<vmem>>) attributes {dimension_semantics = [#tpu.dimension_semantics<parallel>, #tpu.dimension_semantics<parallel>, #tpu.dimension_semantics<arbitrary>], iteration_bounds = array<i64: 1, 1, 1>, scalar_prefetch = 0 : i64, scratch_operands = 1 : i64, tpu.core_type = #tpu.core_type<tc>, window_params = [{transform_indices = @transform_0, window_bounds = array<i64: 16, 128>}, {transform_indices = @transform_1, window_bounds = array<i64: 128, 128>}, {transform_indices = @transform_2, window_bounds = array<i64: 1, 128>}, {transform_indices = @transform_3, window_bounds = array<i64: 16, 128>}]} {
    %c0_i32 = arith.constant 0 : i32
    %0 = arith.cmpi eq, %arg2, %c0_i32 : i32
    %1 = arith.extui %0 : i1 to i32
    %c0_i32_0 = arith.constant 0 : i32
    %2 = arith.cmpi ne, %1, %c0_i32_0 : i32
    scf.if %2 {
      %cst_10 = arith.constant 0.000000e+00 : f32
      %13 = vector.broadcast %cst_10 : f32 to vector<16x128xf32>
      %c0_11 = arith.constant 0 : index
      %c0_12 = arith.constant 0 : index
      %14 = vector.load %arg7[%c0_11, %c0_12] : memref<16x128xf32, #tpu.memory_space<vmem>>, vector<16x128xf32>
      tpu.vector_store %arg7[%c0_11, %c0_12], %13 {strides = array<i32>} : memref<16x128xf32, #tpu.memory_space<vmem>>, vector<16x128xf32>,
    } else {
    }
    %c0 = arith.constant 0 : index
    %c0_1 = arith.constant 0 : index
    %3 = vector.load %arg7[%c0, %c0_1] : memref<16x128xf32, #tpu.memory_space<vmem>>, vector<16x128xf32>
    %c0_2 = arith.constant 0 : index
    %c0_3 = arith.constant 0 : index
    %4 = vector.load %arg3[%c0_2, %c0_3] : memref<16x128xf32, #tpu.memory_space<vmem>>, vector<16x128xf32>
    %5 = arith.truncf %4 : vector<16x128xf32> to vector<16x128xbf16>
    %c0_4 = arith.constant 0 : index
    %c0_5 = arith.constant 0 : index
    %6 = vector.load %arg4[%c0_4, %c0_5] : memref<128x128xbf16, #tpu.memory_space<vmem>>, vector<128x128xbf16>
    %cst = arith.constant dense<0.000000e+00> : vector<16x128xf32>
    %7 = tpu.matmul %5, %6, %cst {dimension_numbers = #tpu.dot_dimension_numbers<[1], [0], [0], [1], [0, 0, 1, 1], [], []>} : vector<16x128xbf16>, vector<128x128xbf16>, vector<16x128xf32> -> vector<16x128xf32>
    %8 = arith.addf %3, %7 : vector<16x128xf32>
    %c0_6 = arith.constant 0 : index
    %c0_7 = arith.constant 0 : index
    %9 = vector.load %arg7[%c0_6, %c0_7] : memref<16x128xf32, #tpu.memory_space<vmem>>, vector<16x128xf32>
    tpu.vector_store %arg7[%c0_6, %c0_7], %8 {strides = array<i32>} : memref<16x128xf32, #tpu.memory_space<vmem>>, vector<16x128xf32>,
    %c0_i32_8 = arith.constant 0 : i32
    %10 = arith.cmpi eq, %arg2, %c0_i32_8 : i32
    %11 = arith.extui %10 : i1 to i32
    %c0_i32_9 = arith.constant 0 : i32
    %12 = arith.cmpi ne, %11, %c0_i32_9 : i32
    scf.if %12 {
      %c0_10 = arith.constant 0 : index
      %c0_11 = arith.constant 0 : index
      %13 = vector.load %arg7[%c0_10, %c0_11] : memref<16x128xf32, #tpu.memory_space<vmem>>, vector<16x128xf32>
      %c0_12 = arith.constant 0 : index
      %c0_13 = arith.constant 0 : index
      %14 = vector.load %arg5[%c0_12, %c0_13] : memref<1x128xf32, #tpu.memory_space<vmem>>, vector<1x128xf32>
      %15 = vector.broadcast %14 : vector<1x128xf32> to vector<16x128xf32>
      %16 = arith.addf %13, %15 : vector<16x128xf32>
      %c0_14 = arith.constant 0 : index
      %c0_15 = arith.constant 0 : index
      %17 = vector.load %arg6[%c0_14, %c0_15] : memref<16x128xf32, #tpu.memory_space<vmem>>, vector<16x128xf32>
      tpu.vector_store %arg6[%c0_14, %c0_15], %16 {strides = array<i32>} : memref<16x128xf32, #tpu.memory_space<vmem>>, vector<16x128xf32>,
    } else {
    }
    return
  }
  func.func @transform_0(%arg0: i32, %arg1: i32, %arg2: i32) -> (i32, i32) {
    %c0_i32 = arith.constant 0 : i32
    return %arg0, %arg2 : i32, i32
  }
  func.func @transform_1(%arg0: i32, %arg1: i32, %arg2: i32) -> (i32, i32) {
    %c0_i32 = arith.constant 0 : i32
    return %arg2, %arg1 : i32, i32
  }
  func.func @transform_2(%arg0: i32, %arg1: i32, %arg2: i32) -> (i32, i32) {
    %c0_i32 = arith.constant 0 : i32
    %c0_i32_0 = arith.constant 0 : i32
    return %c0_i32, %arg1 : i32, i32
  }
  func.func @transform_3(%arg0: i32, %arg1: i32, %arg2: i32) -> (i32, i32) {
    %c0_i32 = arith.constant 0 : i32
    return %arg0, %arg1 : i32, i32
  }
}

</mosaic_0001>

<bundles_post_ra>
// kernel: pallas_linear_2d.1
= control target key start
LH: loop header
LB: loop body
LE: loop exit
PB: predicated region body
PF: predicated region fallthrough
CT: control target
= control target key end

     0   :  { %8 = vsyncpa [#allocation4], 0  ;;  %s346_s0 = inlined_call_operand.vmem [shape: f32[16,128], index: 0, kind: input, shape index: {}]   ;;  %s347_s1 = inlined_call_operand.hbm [shape: bf16[128,128], index: 1, kind: input, shape index: {}]   ;;  %s348_s2 = inlined_call_operand.vmem [shape: f32[1,128], index: 2, kind: input, shape index: {}]   ;;  %s349_s3 = inlined_call_operand.hbm [shape: f32[16,128], index: 3, kind: output, shape index: {}]  }
   0x1   :  { %9 = vsyncpa [#allocation5], 0  ;;  %s285_s12 = smov [#allocation3]   ;;  %s237_s16 = scalar_lea.hbm %s347_s1, 1024 }
   0x2   :  { %s17_s13 = sshll.u32 %s285_s12, 4  ;;  %p238_p0 = scmp.ne.s32.totalorder %s347_s1, %s237_s16  ;;  %s18_s13 = int_to_ptr.vmem [resolvable:$true] %s17_s13 }
   0x3   :  { %p241_p1 = scmp.lt.u32.totalorder %s237_s16, %s347_s1 }
   0x5   :  { %p243_p2 = pnand %p241_p1, %p238_p0 }
   0x7   :  { %246 = shalt.err (!%p243_p2)
}
   0x8   :  { %s247_s21 = scalar_lea.vmem %s18_s13, 1024  ;;  %p252_p4 = scmp.lt.s32.totalorder %s18_s13, %s18_s13 }
   0x9   :  { %p248_p3 = scmp.ne.s32.totalorder %s18_s13, %s247_s21  ;;  %p253_p5 = scmp.lt.s32.totalorder %s247_s21, %s247_s21 }
   0xb   :  { %p254_p6 = por %p253_p5, %p252_p4 }
   0xd   :  { %p255_p7 = pnand %p254_p6, %p248_p3 }
   0xf   :  { %258 = shalt.err (!%p255_p7)
}
  0x10   :  { %s286_s22 = smov 64   ;;  %s287_s23 = smov 4  }
  0x11   :  { %23 = dma.hbm_to_vmem [thread:$0]  %s347_s1, 1024, %s18_s13, [#allocation4], %s286_s22, %s286_s22, %s287_s23  }
  0x12   :  { %281 = dma.done.wait [#allocation4], 1024  }
  0x13   :  { %282 = vsyncadd [#allocation4], 4294966272  ;;  %v288_v0 = vmov 0.0   ;;  %vm289_vm0 = vmmov 0   ;;  %v229_v1 = vld [vmem:[#allocation3] sm:$0xff]   ;;  %v230_v2 = vld [vmem:[#allocation3 + $0x8] sm:$0xff]  }
  0x14   :  { %201 = vmatprep.subr.bf16.mxu0 %v288_v0  ;;  %217 = vmatprep.mubr.msk.bf16.mxu0 %vm289_vm0, %v288_v0  ;;  %v231_v3 = vld [vmem:[#allocation3 + $0x10] sm:$0xff]   ;;  %v232_v4 = vld [vmem:[#allocation3 + $0x18] sm:$0xff]   ;;  %v233_v5 = vld [vmem:[#allocation3 + $0x20] sm:$0xff]   ;;  %s290_s4 = smov [#allocation6]  }
  0x15   :  { %202 = vmatpush3.bf16.msra.mxu0 %v229_v1  ;;  %v234_v6 = vld [vmem:[#allocation3 + $0x28] sm:$0xff]   ;;  %v235_v7 = vld [vmem:[#allocation3 + $0x30] sm:$0xff]   ;;  %v236_v8 = vld [vmem:[#allocation3 + $0x38] sm:$0xff]   ;;  %s171_s5 = sshll.u32 %s290_s4, 4  ;;  %s172_s5 = int_to_ptr.vmem [resolvable:$true] %s171_s5 }
  0x16   :  { %203 = vmatprep.subr.bf16.mxu0 %v288_v0  ;;  %v38_v9 = vld [vmem:[%s346_s0] sm:$0xff]  ;;  %v39_v10 = vld [vmem:[%s346_s0 + $0x8] sm:$0xff]  ;;  %s259_s0 = scalar_lea.vmem %s172_s5, 256  ;;  %p264_p9 = scmp.lt.s32.totalorder %s172_s5, %s172_s5 }
  0x17   :  { %v40_v11 = vpack.c.bf16 %v39_v10, %v38_v9  ;;  %v191_v12 = vld [vmem:[%s348_s2] ss:$0 sm:$0xff]  ;;  %p260_p8 = scmp.ne.s32.totalorder %s172_s5, %s259_s0  ;;  %p265_p10 = scmp.lt.s32.totalorder %s259_s0, %s259_s0 }
  0x19   :  { %204 = vmatpush3.bf16.msra.mxu0 %v230_v2  ;;  %p266_p11 = por %p265_p10, %p264_p9 }
  0x1a   :  { %205 = vmatprep.subr.bf16.mxu0 %v288_v0 }
  0x1b   :  { %p267_p12 = pnand %p266_p11, %p260_p8 }
  0x1d   :  { %206 = vmatpush3.bf16.msra.mxu0 %v231_v3 }
  0x1e   :  { %207 = vmatprep.subr.bf16.mxu0 %v288_v0 }
  0x21   :  { %208 = vmatpush3.bf16.msra.mxu0 %v232_v4 }
  0x22   :  { %209 = vmatprep.subr.bf16.mxu0 %v288_v0 }
  0x25   :  { %210 = vmatpush3.bf16.msra.mxu0 %v233_v5 }
  0x26   :  { %211 = vmatprep.subr.bf16.mxu0 %v288_v0 }
  0x29   :  { %212 = vmatpush3.bf16.msra.mxu0 %v234_v6 }
  0x2a   :  { %213 = vmatprep.subr.bf16.mxu0 %v288_v0 }
  0x2d   :  { %214 = vmatpush3.bf16.msra.mxu0 %v235_v7 }
  0x2e   :  { %215 = vmatprep.subr.bf16.mxu0 %v288_v0 }
  0x31   :  { %216 = vmatpush3.bf16.msra.mxu0 %v236_v8 }
  0x34   :  { %218 = vmatmul.mubr.bf16.vlgmr.msra.gmra.mrb[0].mxu0 %v40_v11 }
 0x107   :  { %v139_v13 = vpop.f32.mrb[0].mxu0 }
 0x108   :  { %v162_v14 = vadd.f32 %v191_v12, %v139_v13  ;;  %v219_v15 = vpop.f32.mrb[1].mxu0 }
 0x109   :  { %v142_v16 = vpop.f32.mrb[2].mxu0 }
 0x10a   :  { %164 = vst [vmem:[#allocation6] sm:$0xff] %v162_v14  ;;  %v163_v17 = vadd.f32 %v191_v12, %v142_v16  ;;  %v220_v18 = vpop.f32.mrb[3].mxu0 }
 0x10c   :  { %165 = vst [vmem:[#allocation6 + $0x8] sm:$0xff] %v163_v17 }
 0x10d   :  { %270 = shalt.err (!%p267_p12)
}
 0x10e   :  { %s271_s7 = scalar_lea.hbm %s349_s3, 256 }
 0x10f   :  { %p272_p13 = scmp.ne.s32.totalorder %s349_s3, %s271_s7  ;;  %p275_p0 = scmp.lt.u32.totalorder %s271_s7, %s349_s3 }
 0x111   :  { %p277_p1 = pnand %p275_p0, %p272_p13 }
 0x113   :  { %280 = shalt.err (!%p277_p1)
}
 0x114   :  { %s291_s12 = smov 128   ;;  %s292_s13 = smov 8  }
 0x115   :  { %177 = dma.vmem_to_hbm [thread:$0]  %s172_s5, 256, %s349_s3, [#allocation5], %s291_s12, %s291_s12, %s292_s13  }
 0x116   :  { %283 = dma.done.wait [#allocation5], 256  }
 0x117   :  { %284 = vsyncadd [#allocation5], 4294967040 }
 0x118   :  { %181 = vsyncpa [#allocation4], 1 }
 0x119   :  { %182 = vsyncpa [#allocation5], 1 }

</bundles_post_ra>
